<compile_context>
chip_gen: v7x
topology: tpu7x:2x2x1
jax: 0.10.0
libtpu: 0.0.40
codegen_flags: <defaults>
</compile_context>

<pallas_src>
import functools

import jax
import jax.numpy as jnp
from jax.experimental import pallas as pl
from jax.experimental.pallas import tpu as pltpu


LR = 0.001  # learning rate used in `new_weight - 0.001 * grad`


def _unrolled_kernel(
    # inputs
    w_init_ref,                          # (1, D)   initial student.lin.weight
    wgw_ref, wgz_ref, wgy_ref, bg_ref,   # generator: (D,D) (Z,D) (1,D) (1,D)
    wdx_ref, wdy_ref, bd_ref,            # discriminator: (D,1), SMEM (1,), SMEM (1,)
    gtx_last_ref,                        # (B, D)   last sampled batch features
    gty_ref,                             # (T*B, 1) per-step labels, flattened
    z_ref,                               # (T*B, Z) per-step latents, flattened
    gty_f_ref, z_f_ref, valid_ref,       # final batch (B,1) (B,Z) (B,1)
    # outputs
    loss_ref, gen_ref, gloss_ref, wout_ref,
    *, n_unroll,
):
    T = n_unroll
    B, D = gtx_last_ref.shape

    # Hoisted parameter / batch loads (one VMEM->vreg load each).
    wgw = wgw_ref[...]
    wgz = wgz_ref[...]
    wgy = wgy_ref[...]
    bg = bg_ref[...]
    gty_all = gty_ref[...]               # (T*B, 1)
    z_all = z_ref[...]                   # (T*B, Z)

    # w-independent generator terms for all T steps in one batched matmul,
    # pulled out of the serial dependency chain:
    #   pre_const[t*B:(t+1)*B] = z_t @ wgz + gt_y_t * wgy + bg
    pre_const = (
        jnp.dot(z_all, wgz, preferred_element_type=jnp.float32)
        + gty_all * wgy
        + bg
    )                                    # (T*B, D)

    # Serial unroll: w carried in vregs (no grid step, no scratch round-trip).
    w = w_init_ref[...]                  # (1, D)
    for t in range(T):                   # T is tiny & static -> fully unrolled
        lo = t * B
        gt_y = gty_all[lo:lo + B]        # (B, 1)
        w_norm = w * jax.lax.rsqrt(jnp.sum(w * w))          # w_t / torch.norm(w_t)
        wproj = jnp.dot(w_norm, wgw, preferred_element_type=jnp.float32)  # (1, D)
        gen_x = jnp.tanh(pre_const[lo:lo + B] + wproj)      # (B, D)
        # Student forward + analytic MSE grad as VPU multiply + XLU reduce
        # (replaces the MXU matvec + transposes of the previous version).
        out = jnp.sum(gen_x * w, axis=1, keepdims=True)     # (B, 1) == gen_x @ w.T
        err = out - gt_y
        grad = (2.0 / B) * jnp.sum(err * gen_x, axis=0, keepdims=True)  # (1, D)
        w = w - LR * grad

    # ---- finalize (runs once, off the per-step critical path) ----
    tau = 1.0  # i = randint(0, nb_batch) is never -1, so tau stays 1
    gt_y_last = gty_all[(T - 1) * B:T * B]                  # (B, 1)
    out_stu = jnp.dot(w, gtx_last_ref[...].T,
                      preferred_element_type=jnp.float32)   # (1, B)
    # PyTorch nn.MSELoss broadcasts (1,B) against (B,1) -> mean over (B,B).
    # Intentional faithful reproduction; do NOT "fix" into a per-sample MSE.
    diff = out_stu - gt_y_last
    loss_ref[...] = (tau * jnp.mean(diff * diff)).reshape(1, 1)

    gty_f = gty_f_ref[...]               # (B, 1)
    z_f = z_f_ref[...]                   # (B, Z)
    # NOTE: final generator call uses the UNNORMALIZED student weight.
    pre_f = (
        jnp.dot(z_f, wgz, preferred_element_type=jnp.float32)
        + gty_f * wgy
        + jnp.dot(w, wgw, preferred_element_type=jnp.float32)
        + bg
    )
    gen_samples = jnp.tanh(pre_f)        # (B, D)
    gen_ref[...] = gen_samples

    # netD(generated_samples, labels) -> affine + sigmoid; wdy/bd read from SMEM.
    logits = (
        jnp.dot(gen_samples, wdx_ref[...], preferred_element_type=jnp.float32)
        + gty_f * wdy_ref[0]
        + bd_ref[0]
    )
    validity = jax.nn.sigmoid(logits)    # (B, 1)
    gdiff = validity - valid_ref[...]
    gloss_ref[...] = jnp.mean(gdiff * gdiff).reshape(1, 1)

    wout_ref[...] = w


def unrolled_blackbox_forward(
    w_init, wgw, wgz, wgy, bg, wdx, wdy, bd,
    gtx_batches, gty_batches, z_batches,
    gty_final, z_final, valid,
):
    T, B, D = gtx_batches.shape
    Z = z_batches.shape[-1]

    # Layout plumbing only (no compute hoisted out of the kernel):
    #  * flatten the per-step batches so the kernel can batch the w-independent
    #    generator matmul over all T steps at once,
    #  * only the LAST gt_x batch is ever read by the forward, so pass just it,
    #  * scalar discriminator params go to SMEM as 1-D refs.
    gtx_last = gtx_batches[T - 1]                    # (B, D)
    gty_flat = gty_batches.reshape(T * B, 1)
    z_flat = z_batches.reshape(T * B, Z)
    wdy_s = wdy.reshape(1)
    bd_s = bd.reshape(1)

    vmem = pl.BlockSpec(memory_space=pltpu.MemorySpace.VMEM)
    smem = pl.BlockSpec(memory_space=pltpu.MemorySpace.SMEM)

    out_shapes = (
        jax.ShapeDtypeStruct((1, 1), jnp.float32),   # loss_stu
        jax.ShapeDtypeStruct((B, D), jnp.float32),   # generated_samples
        jax.ShapeDtypeStruct((1, 1), jnp.float32),   # g_loss
        jax.ShapeDtypeStruct((1, D), jnp.float32),   # final student weight
    )

    return pl.pallas_call(
        functools.partial(_unrolled_kernel, n_unroll=T),
        out_shape=out_shapes,
        # single invocation, no grid: everything (a few KiB) resident in
        # VMEM/SMEM at once; the unroll is an in-kernel loop.
        in_specs=[vmem, vmem, vmem, vmem, vmem, vmem, smem, smem,
                  vmem, vmem, vmem, vmem, vmem, vmem],
        out_specs=(vmem, vmem, vmem, vmem),
    )(w_init, wgw, wgz, wgy, bg, wdx, wdy_s, bd_s,
      gtx_last, gty_flat, z_flat, gty_final, z_final, valid)


def _reference(w_init, wgw, wgz, wgy, bg, wdx, wdy, bd,
               gtx_b, gty_b, z_b, gty_f, z_f, valid):
    """Pure-JAX reference of the same forward (for correctness check)."""
    with jax.default_matmul_precision("highest"):
        w = w_init
        B = gtx_b.shape[1]
        for t in range(gtx_b.shape[0]):
            w_n = w / jnp.linalg.norm(w)
            gt_x, gt_y, z = gtx_b[t], gty_b[t], z_b[t]
            gen_x = jnp.tanh(z @ wgz + gt_y @ wgy + w_n @ wgw + bg)
            out = gen_x @ w.T
            err = out - gt_y
            grad = (2.0 / B) * (err.T @ gen_x)
            w = w - LR * grad
        out_stu = w @ gt_x.T
        diff = out_stu - gt_y
        loss_stu = jnp.mean(diff * diff)
        gen_samples = jnp.tanh(z_f @ wgz + gty_f @ wgy + w @ wgw + bg)
        validity = jax.nn.sigmoid(gen_samples @ wdx + gty_f * wdy + bd)
        g_loss = jnp.mean((validity - valid) ** 2)
        return loss_stu, gen_samples, g_loss, w


if __name__ == "__main__":
    # "opt" hyper-parameters (small, consistent with the module's forward)
    batch_size = 8        # opt.batch_size
    latent_dim = 8        # opt.latent_dim
    n_unroll = 4          # opt.n_unroll_blocks
    dim = 16              # student feature dim (projected moon features)
    n_total = 64          # dataset size -> nb_batch = 8

    key = jax.random.PRNGKey(0)
    keys = jax.random.split(key, 12)

    # dataset (self.X, self.Y) — Y kept as (N, 1) float targets
    X = jax.random.normal(keys[0], (n_total, dim), jnp.float32)
    Y = (jax.random.uniform(keys[1], (n_total, 1)) > 0.5).astype(jnp.float32)

    # deterministic "network" parameters (generator / student / discriminator)
    w_init = 0.1 * jax.random.normal(keys[2], (1, dim), jnp.float32)
    wgw = 0.2 * jax.random.normal(keys[3], (dim, dim), jnp.float32)
    wgz = 0.2 * jax.random.normal(keys[4], (latent_dim, dim), jnp.float32)
    wgy = 0.2 * jax.random.normal(keys[5], (1, dim), jnp.float32)
    bg = 0.05 * jax.random.normal(keys[6], (1, dim), jnp.float32)
    wdx = 0.3 * jax.random.normal(keys[7], (dim, 1), jnp.float32)
    wdy = 0.3 * jax.random.normal(keys[8], (1, 1), jnp.float32)
    bd = jnp.zeros((1, 1), jnp.float32)

    # deterministic replacements for torch.randint / torch.randn sampling
    nb_batch = n_total // batch_size
    batch_idx = jax.random.randint(keys[9], (n_unroll + 1,), 0, nb_batch)
    starts = batch_idx * batch_size
    gtx_batches = jnp.stack(
        [jax.lax.dynamic_slice(X, (starts[t], 0), (batch_size, dim))
         for t in range(n_unroll)])
    gty_batches = jnp.stack(
        [jax.lax.dynamic_slice(Y, (starts[t], 0), (batch_size, 1))
         for t in range(n_unroll)])
    z_batches = jax.random.normal(keys[10], (n_unroll, batch_size, latent_dim),
                                  jnp.float32)

    gty_final = jax.lax.dynamic_slice(Y, (starts[n_unroll], 0), (batch_size, 1))
    z_final = jax.random.normal(keys[11], (batch_size, latent_dim), jnp.float32)
    valid = jnp.ones((batch_size, 1), jnp.float32)

    args = (w_init, wgw, wgz, wgy, bg, wdx, wdy, bd,
            gtx_batches, gty_batches, z_batches, gty_final, z_final, valid)

    loss_stu, gen_samples, g_loss, w_final = jax.block_until_ready(
        unrolled_blackbox_forward(*args))

    ref_loss, ref_gen, ref_gloss, ref_w = _reference(*args)
    assert jnp.allclose(loss_stu[0, 0], ref_loss, rtol=1e-3, atol=1e-3)
    assert jnp.allclose(gen_samples, ref_gen, rtol=1e-3, atol=1e-3)
    assert jnp.allclose(g_loss[0, 0], ref_gloss, rtol=1e-3, atol=1e-3)
    assert jnp.allclose(w_final, ref_w, rtol=1e-3, atol=1e-3)

    print("KERNEL_OK")
</pallas_src>

<mosaic_0001>
module attributes {stable_mosaic.version = 11 : i64} {
  func.func @_unrolled_kernel(%arg0: memref<1x16xf32, #tpu.memory_space<vmem>>, %arg1: memref<16x16xf32, #tpu.memory_space<vmem>>, %arg2: memref<8x16xf32, #tpu.memory_space<vmem>>, %arg3: memref<1x16xf32, #tpu.memory_space<vmem>>, %arg4: memref<1x16xf32, #tpu.memory_space<vmem>>, %arg5: memref<16x1xf32, #tpu.memory_space<vmem>>, %arg6: memref<1xf32, #tpu.memory_space<smem>>, %arg7: memref<1xf32, #tpu.memory_space<smem>>, %arg8: memref<8x16xf32, #tpu.memory_space<vmem>>, %arg9: memref<32x1xf32, #tpu.memory_space<vmem>>, %arg10: memref<32x8xf32, #tpu.memory_space<vmem>>, %arg11: memref<8x1xf32, #tpu.memory_space<vmem>>, %arg12: memref<8x8xf32, #tpu.memory_space<vmem>>, %arg13: memref<8x1xf32, #tpu.memory_space<vmem>>, %arg14: memref<1x1xf32, #tpu.memory_space<vmem>>, %arg15: memref<8x16xf32, #tpu.memory_space<vmem>>, %arg16: memref<1x1xf32, #tpu.memory_space<vmem>>, %arg17: memref<1x16xf32, #tpu.memory_space<vmem>>) attributes {dimension_semantics = [], scalar_prefetch = 0 : i64, scratch_operands = 0 : i64, tpu.core_type = #tpu.core_type<tc>} {
    %c0 = arith.constant 0 : index
    %c0_0 = arith.constant 0 : index
    %0 = vector.load %arg1[%c0, %c0_0] : memref<16x16xf32, #tpu.memory_space<vmem>>, vector<16x16xf32>
    %c0_1 = arith.constant 0 : index
    %c0_2 = arith.constant 0 : index
    %1 = vector.load %arg2[%c0_1, %c0_2] : memref<8x16xf32, #tpu.memory_space<vmem>>, vector<8x16xf32>
    %c0_3 = arith.constant 0 : index
    %c0_4 = arith.constant 0 : index
    %2 = vector.load %arg3[%c0_3, %c0_4] : memref<1x16xf32, #tpu.memory_space<vmem>>, vector<1x16xf32>
    %c0_5 = arith.constant 0 : index
    %c0_6 = arith.constant 0 : index
    %3 = vector.load %arg4[%c0_5, %c0_6] : memref<1x16xf32, #tpu.memory_space<vmem>>, vector<1x16xf32>
    %c0_7 = arith.constant 0 : index
    %c0_8 = arith.constant 0 : index
    %4 = vector.load %arg9[%c0_7, %c0_8] : memref<32x1xf32, #tpu.memory_space<vmem>>, vector<32x1xf32>
    %c0_9 = arith.constant 0 : index
    %c0_10 = arith.constant 0 : index
    %5 = vector.load %arg10[%c0_9, %c0_10] : memref<32x8xf32, #tpu.memory_space<vmem>>, vector<32x8xf32>
    %cst = arith.constant dense<0.000000e+00> : vector<32x16xf32>
    %6 = tpu.matmul %5, %1, %cst {dimension_numbers = #tpu.dot_dimension_numbers<[1], [0], [0], [1], [0, 0, 1, 1], [], []>} : vector<32x8xf32>, vector<8x16xf32>, vector<32x16xf32> -> vector<32x16xf32>
    %7 = vector.broadcast %4 : vector<32x1xf32> to vector<32x16xf32>
    %8 = vector.broadcast %2 : vector<1x16xf32> to vector<32x16xf32>
    %9 = arith.mulf %7, %8 : vector<32x16xf32>
    %10 = arith.addf %6, %9 : vector<32x16xf32>
    %11 = vector.broadcast %3 : vector<1x16xf32> to vector<32x16xf32>
    %12 = arith.addf %10, %11 : vector<32x16xf32>
    %c0_11 = arith.constant 0 : index
    %c0_12 = arith.constant 0 : index
    %13 = vector.load %arg0[%c0_11, %c0_12] : memref<1x16xf32, #tpu.memory_space<vmem>>, vector<1x16xf32>
    %14 = vector.extract_strided_slice %4 {offsets = [0, 0], sizes = [8, 1], strides = [1, 1]} : vector<32x1xf32> to vector<8x1xf32>
    %15 = arith.mulf %13, %13 : vector<1x16xf32>
    %16 = vector.shape_cast %15 : vector<1x16xf32> to vector<1x1x16xf32>
    %cst_13 = arith.constant dense<0.000000e+00> : vector<1xf32>
    %17 = vector.multi_reduction <add>, %16, %cst_13 [1, 2] : vector<1x1x16xf32> to vector<1xf32>
    %18 = vector.shape_cast %17 : vector<1xf32> to vector<1x1x1xf32>
    %19 = vector.extract %18[0, 0, 0] : f32 from vector<1x1x1xf32>
    %20 = math.rsqrt %19 : f32
    %21 = vector.broadcast %20 : f32 to vector<1x16xf32>
    %22 = arith.mulf %13, %21 : vector<1x16xf32>
    %cst_14 = arith.constant dense<0.000000e+00> : vector<1x16xf32>
    %23 = tpu.matmul %22, %0, %cst_14 {dimension_numbers = #tpu.dot_dimension_numbers<[1], [0], [0], [1], [0, 0, 1, 1], [], []>} : vector<1x16xf32>, vector<16x16xf32>, vector<1x16xf32> -> vector<1x16xf32>
    %24 = vector.extract_strided_slice %12 {offsets = [0, 0], sizes = [8, 16], strides = [1, 1]} : vector<32x16xf32> to vector<8x16xf32>
    %25 = vector.broadcast %23 : vector<1x16xf32> to vector<8x16xf32>
    %26 = arith.addf %24, %25 : vector<8x16xf32>
    %27 = math.tanh %26 : vector<8x16xf32>
    %28 = vector.broadcast %13 : vector<1x16xf32> to vector<8x16xf32>
    %29 = arith.mulf %27, %28 : vector<8x16xf32>
    %cst_15 = arith.constant dense<0.000000e+00> : vector<8xf32>
    %30 = vector.multi_reduction <add>, %29, %cst_15 [1] : vector<8x16xf32> to vector<8xf32>
    %31 = vector.shape_cast %30 : vector<8xf32> to vector<8x1xf32>
    %32 = arith.subf %31, %14 : vector<8x1xf32>
    %33 = vector.broadcast %32 : vector<8x1xf32> to vector<8x16xf32>
    %34 = arith.mulf %33, %27 : vector<8x16xf32>
    %cst_16 = arith.constant dense<0.000000e+00> : vector<16xf32>
    %35 = vector.multi_reduction <add>, %34, %cst_16 [0] : vector<8x16xf32> to vector<16xf32>
    %36 = vector.shape_cast %35 : vector<16xf32> to vector<1x16xf32>
    %cst_17 = arith.constant 2.500000e-01 : f32
    %37 = vector.broadcast %cst_17 : f32 to vector<1x16xf32>
    %38 = arith.mulf %37, %36 : vector<1x16xf32>
    %cst_18 = arith.constant 1.000000e-03 : f32
    %39 = vector.broadcast %cst_18 : f32 to vector<1x16xf32>
    %40 = arith.mulf %39, %38 : vector<1x16xf32>
    %41 = arith.subf %13, %40 : vector<1x16xf32>
    %42 = vector.extract_strided_slice %4 {offsets = [8, 0], sizes = [8, 1], strides = [1, 1]} : vector<32x1xf32> to vector<8x1xf32>
    %43 = arith.mulf %41, %41 : vector<1x16xf32>
    %44 = vector.shape_cast %43 : vector<1x16xf32> to vector<1x1x16xf32>
    %cst_19 = arith.constant dense<0.000000e+00> : vector<1xf32>
    %45 = vector.multi_reduction <add>, %44, %cst_19 [1, 2] : vector<1x1x16xf32> to vector<1xf32>
    %46 = vector.shape_cast %45 : vector<1xf32> to vector<1x1x1xf32>
    %47 = vector.extract %46[0, 0, 0] : f32 from vector<1x1x1xf32>
    %48 = math.rsqrt %47 : f32
    %49 = vector.broadcast %48 : f32 to vector<1x16xf32>
    %50 = arith.mulf %41, %49 : vector<1x16xf32>
    %cst_20 = arith.constant dense<0.000000e+00> : vector<1x16xf32>
    %51 = tpu.matmul %50, %0, %cst_20 {dimension_numbers = #tpu.dot_dimension_numbers<[1], [0], [0], [1], [0, 0, 1, 1], [], []>} : vector<1x16xf32>, vector<16x16xf32>, vector<1x16xf32> -> vector<1x16xf32>
    %52 = vector.extract_strided_slice %12 {offsets = [8, 0], sizes = [8, 16], strides = [1, 1]} : vector<32x16xf32> to vector<8x16xf32>
    %53 = vector.broadcast %51 : vector<1x16xf32> to vector<8x16xf32>
    %54 = arith.addf %52, %53 : vector<8x16xf32>
    %55 = math.tanh %54 : vector<8x16xf32>
    %56 = vector.broadcast %41 : vector<1x16xf32> to vector<8x16xf32>
    %57 = arith.mulf %55, %56 : vector<8x16xf32>
    %cst_21 = arith.constant dense<0.000000e+00> : vector<8xf32>
    %58 = vector.multi_reduction <add>, %57, %cst_21 [1] : vector<8x16xf32> to vector<8xf32>
    %59 = vector.shape_cast %58 : vector<8xf32> to vector<8x1xf32>
    %60 = arith.subf %59, %42 : vector<8x1xf32>
    %61 = vector.broadcast %60 : vector<8x1xf32> to vector<8x16xf32>
    %62 = arith.mulf %61, %55 : vector<8x16xf32>
    %cst_22 = arith.constant dense<0.000000e+00> : vector<16xf32>
    %63 = vector.multi_reduction <add>, %62, %cst_22 [0] : vector<8x16xf32> to vector<16xf32>
    %64 = vector.shape_cast %63 : vector<16xf32> to vector<1x16xf32>
    %cst_23 = arith.constant 2.500000e-01 : f32
    %65 = vector.broadcast %cst_23 : f32 to vector<1x16xf32>
    %66 = arith.mulf %65, %64 : vector<1x16xf32>
    %cst_24 = arith.constant 1.000000e-03 : f32
    %67 = vector.broadcast %cst_24 : f32 to vector<1x16xf32>
    %68 = arith.mulf %67, %66 : vector<1x16xf32>
    %69 = arith.subf %41, %68 : vector<1x16xf32>
    %70 = vector.extract_strided_slice %4 {offsets = [16, 0], sizes = [8, 1], strides = [1, 1]} : vector<32x1xf32> to vector<8x1xf32>
    %71 = arith.mulf %69, %69 : vector<1x16xf32>
    %72 = vector.shape_cast %71 : vector<1x16xf32> to vector<1x1x16xf32>
    %cst_25 = arith.constant dense<0.000000e+00> : vector<1xf32>
    %73 = vector.multi_reduction <add>, %72, %cst_25 [1, 2] : vector<1x1x16xf32> to vector<1xf32>
    %74 = vector.shape_cast %73 : vector<1xf32> to vector<1x1x1xf32>
    %75 = vector.extract %74[0, 0, 0] : f32 from vector<1x1x1xf32>
    %76 = math.rsqrt %75 : f32
    %77 = vector.broadcast %76 : f32 to vector<1x16xf32>
    %78 = arith.mulf %69, %77 : vector<1x16xf32>
    %cst_26 = arith.constant dense<0.000000e+00> : vector<1x16xf32>
    %79 = tpu.matmul %78, %0, %cst_26 {dimension_numbers = #tpu.dot_dimension_numbers<[1], [0], [0], [1], [0, 0, 1, 1], [], []>} : vector<1x16xf32>, vector<16x16xf32>, vector<1x16xf32> -> vector<1x16xf32>
    %80 = vector.extract_strided_slice %12 {offsets = [16, 0], sizes = [8, 16], strides = [1, 1]} : vector<32x16xf32> to vector<8x16xf32>
    %81 = vector.broadcast %79 : vector<1x16xf32> to vector<8x16xf32>
    %82 = arith.addf %80, %81 : vector<8x16xf32>
    %83 = math.tanh %82 : vector<8x16xf32>
    %84 = vector.broadcast %69 : vector<1x16xf32> to vector<8x16xf32>
    %85 = arith.mulf %83, %84 : vector<8x16xf32>
    %cst_27 = arith.constant dense<0.000000e+00> : vector<8xf32>
    %86 = vector.multi_reduction <add>, %85, %cst_27 [1] : vector<8x16xf32> to vector<8xf32>
    %87 = vector.shape_cast %86 : vector<8xf32> to vector<8x1xf32>
    %88 = arith.subf %87, %70 : vector<8x1xf32>
    %89 = vector.broadcast %88 : vector<8x1xf32> to vector<8x16xf32>
    %90 = arith.mulf %89, %83 : vector<8x16xf32>
    %cst_28 = arith.constant dense<0.000000e+00> : vector<16xf32>
    %91 = vector.multi_reduction <add>, %90, %cst_28 [0] : vector<8x16xf32> to vector<16xf32>
    %92 = vector.shape_cast %91 : vector<16xf32> to vector<1x16xf32>
    %cst_29 = arith.constant 2.500000e-01 : f32
    %93 = vector.broadcast %cst_29 : f32 to vector<1x16xf32>
    %94 = arith.mulf %93, %92 : vector<1x16xf32>
    %cst_30 = arith.constant 1.000000e-03 : f32
    %95 = vector.broadcast %cst_30 : f32 to vector<1x16xf32>
    %96 = arith.mulf %95, %94 : vector<1x16xf32>
    %97 = arith.subf %69, %96 : vector<1x16xf32>
    %98 = vector.extract_strided_slice %4 {offsets = [24, 0], sizes = [8, 1], strides = [1, 1]} : vector<32x1xf32> to vector<8x1xf32>
    %99 = arith.mulf %97, %97 : vector<1x16xf32>
    %100 = vector.shape_cast %99 : vector<1x16xf32> to vector<1x1x16xf32>
    %cst_31 = arith.constant dense<0.000000e+00> : vector<1xf32>
    %101 = vector.multi_reduction <add>, %100, %cst_31 [1, 2] : vector<1x1x16xf32> to vector<1xf32>
    %102 = vector.shape_cast %101 : vector<1xf32> to vector<1x1x1xf32>
    %103 = vector.extract %102[0, 0, 0] : f32 from vector<1x1x1xf32>
    %104 = math.rsqrt %103 : f32
    %105 = vector.broadcast %104 : f32 to vector<1x16xf32>
    %106 = arith.mulf %97, %105 : vector<1x16xf32>
    %cst_32 = arith.constant dense<0.000000e+00> : vector<1x16xf32>
    %107 = tpu.matmul %106, %0, %cst_32 {dimension_numbers = #tpu.dot_dimension_numbers<[1], [0], [0], [1], [0, 0, 1, 1], [], []>} : vector<1x16xf32>, vector<16x16xf32>, vector<1x16xf32> -> vector<1x16xf32>
    %108 = vector.extract_strided_slice %12 {offsets = [24, 0], sizes = [8, 16], strides = [1, 1]} : vector<32x16xf32> to vector<8x16xf32>
    %109 = vector.broadcast %107 : vector<1x16xf32> to vector<8x16xf32>
    %110 = arith.addf %108, %109 : vector<8x16xf32>
    %111 = math.tanh %110 : vector<8x16xf32>
    %112 = vector.broadcast %97 : vector<1x16xf32> to vector<8x16xf32>
    %113 = arith.mulf %111, %112 : vector<8x16xf32>
    %cst_33 = arith.constant dense<0.000000e+00> : vector<8xf32>
    %114 = vector.multi_reduction <add>, %113, %cst_33 [1] : vector<8x16xf32> to vector<8xf32>
    %115 = vector.shape_cast %114 : vector<8xf32> to vector<8x1xf32>
    %116 = arith.subf %115, %98 : vector<8x1xf32>
    %117 = vector.broadcast %116 : vector<8x1xf32> to vector<8x16xf32>
    %118 = arith.mulf %117, %111 : vector<8x16xf32>
    %cst_34 = arith.constant dense<0.000000e+00> : vector<16xf32>
    %119 = vector.multi_reduction <add>, %118, %cst_34 [0] : vector<8x16xf32> to vector<16xf32>
    %120 = vector.shape_cast %119 : vector<16xf32> to vector<1x16xf32>
    %cst_35 = arith.constant 2.500000e-01 : f32
    %121 = vector.broadcast %cst_35 : f32 to vector<1x16xf32>
    %122 = arith.mulf %121, %120 : vector<1x16xf32>
    %cst_36 = arith.constant 1.000000e-03 : f32
    %123 = vector.broadcast %cst_36 : f32 to vector<1x16xf32>
    %124 = arith.mulf %123, %122 : vector<1x16xf32>
    %125 = arith.subf %97, %124 : vector<1x16xf32>
    %126 = vector.extract_strided_slice %4 {offsets = [24, 0], sizes = [8, 1], strides = [1, 1]} : vector<32x1xf32> to vector<8x1xf32>
    %c0_37 = arith.constant 0 : index
    %c0_38 = arith.constant 0 : index
    %127 = vector.load %arg8[%c0_37, %c0_38] : memref<8x16xf32, #tpu.memory_space<vmem>>, vector<8x16xf32>
    %128 = tpu.transpose %127, [1, 0] : vector<8x16xf32> -> vector<16x8xf32>
    %cst_39 = arith.constant dense<0.000000e+00> : vector<1x8xf32>
    %129 = tpu.matmul %125, %128, %cst_39 {dimension_numbers = #tpu.dot_dimension_numbers<[1], [0], [0], [1], [0, 0, 1, 1], [], []>} : vector<1x16xf32>, vector<16x8xf32>, vector<1x8xf32> -> vector<1x8xf32>
    %130 = vector.broadcast %129 : vector<1x8xf32> to vector<8x8xf32>
    %131 = vector.broadcast %126 : vector<8x1xf32> to vector<8x8xf32>
    %132 = arith.subf %130, %131 : vector<8x8xf32>
    %133 = arith.mulf %132, %132 : vector<8x8xf32>
    %134 = vector.shape_cast %133 : vector<8x8xf32> to vector<1x8x8xf32>
    %cst_40 = arith.constant dense<0.000000e+00> : vector<1xf32>
    %135 = vector.multi_reduction <add>, %134, %cst_40 [1, 2] : vector<1x8x8xf32> to vector<1xf32>
    %136 = vector.shape_cast %135 : vector<1xf32> to vector<1x1x1xf32>
    %137 = vector.extract %136[0, 0, 0] : f32 from vector<1x1x1xf32>
    %cst_41 = arith.constant 6.400000e+01 : f32
    %138 = arith.divf %137, %cst_41 : f32
    %cst_42 = arith.constant 1.000000e+00 : f32
    %139 = arith.mulf %cst_42, %138 : f32
    %140 = vector.broadcast %139 : f32 to vector<1x1xf32>
    %c0_43 = arith.constant 0 : index
    %c0_44 = arith.constant 0 : index
    %141 = vector.load %arg14[%c0_43, %c0_44] : memref<1x1xf32, #tpu.memory_space<vmem>>, vector<1x1xf32>
    tpu.vector_store %arg14[%c0_43, %c0_44], %140 {strides = array<i32>} : memref<1x1xf32, #tpu.memory_space<vmem>>, vector<1x1xf32>,
    %c0_45 = arith.constant 0 : index
    %c0_46 = arith.constant 0 : index
    %142 = vector.load %arg11[%c0_45, %c0_46] : memref<8x1xf32, #tpu.memory_space<vmem>>, vector<8x1xf32>
    %c0_47 = arith.constant 0 : index
    %c0_48 = arith.constant 0 : index
    %143 = vector.load %arg12[%c0_47, %c0_48] : memref<8x8xf32, #tpu.memory_space<vmem>>, vector<8x8xf32>
    %cst_49 = arith.constant dense<0.000000e+00> : vector<8x16xf32>
    %144 = tpu.matmul %143, %1, %cst_49 {dimension_numbers = #tpu.dot_dimension_numbers<[1], [0], [0], [1], [0, 0, 1, 1], [], []>} : vector<8x8xf32>, vector<8x16xf32>, vector<8x16xf32> -> vector<8x16xf32>
    %145 = vector.broadcast %142 : vector<8x1xf32> to vector<8x16xf32>
    %146 = vector.broadcast %2 : vector<1x16xf32> to vector<8x16xf32>
    %147 = arith.mulf %145, %146 : vector<8x16xf32>
    %148 = arith.addf %144, %147 : vector<8x16xf32>
    %cst_50 = arith.constant dense<0.000000e+00> : vector<1x16xf32>
    %149 = tpu.matmul %125, %0, %cst_50 {dimension_numbers = #tpu.dot_dimension_numbers<[1], [0], [0], [1], [0, 0, 1, 1], [], []>} : vector<1x16xf32>, vector<16x16xf32>, vector<1x16xf32> -> vector<1x16xf32>
    %150 = vector.broadcast %149 : vector<1x16xf32> to vector<8x16xf32>
    %151 = arith.addf %148, %150 : vector<8x16xf32>
    %152 = vector.broadcast %3 : vector<1x16xf32> to vector<8x16xf32>
    %153 = arith.addf %151, %152 : vector<8x16xf32>
    %154 = math.tanh %153 : vector<8x16xf32>
    %c0_51 = arith.constant 0 : index
    %c0_52 = arith.constant 0 : index
    %155 = vector.load %arg15[%c0_51, %c0_52] : memref<8x16xf32, #tpu.memory_space<vmem>>, vector<8x16xf32>
    tpu.vector_store %arg15[%c0_51, %c0_52], %154 {strides = array<i32>} : memref<8x16xf32, #tpu.memory_space<vmem>>, vector<8x16xf32>,
    %c0_53 = arith.constant 0 : index
    %c0_54 = arith.constant 0 : index
    %156 = vector.load %arg5[%c0_53, %c0_54] : memref<16x1xf32, #tpu.memory_space<vmem>>, vector<16x1xf32>
    %cst_55 = arith.constant dense<0.000000e+00> : vector<8x1xf32>
    %157 = tpu.matmul %154, %156, %cst_55 {dimension_numbers = #tpu.dot_dimension_numbers<[1], [0], [0], [1], [0, 0, 1, 1], [], []>} : vector<8x16xf32>, vector<16x1xf32>, vector<8x1xf32> -> vector<8x1xf32>
    %c0_56 = arith.constant 0 : index
    %158 = memref.load %arg6[%c0_56] : memref<1xf32, #tpu.memory_space<smem>>
    %159 = vector.broadcast %158 : f32 to vector<8x1xf32>
    %160 = arith.mulf %142, %159 : vector<8x1xf32>
    %161 = arith.addf %157, %160 : vector<8x1xf32>
    %c0_57 = arith.constant 0 : index
    %162 = memref.load %arg7[%c0_57] : memref<1xf32, #tpu.memory_space<smem>>
    %163 = vector.broadcast %162 : f32 to vector<8x1xf32>
    %164 = arith.addf %161, %163 : vector<8x1xf32>
    %165 = arith.negf %164 : vector<8x1xf32>
    %166 = math.exp %165 : vector<8x1xf32>
    %cst_58 = arith.constant 1.000000e+00 : f32
    %167 = vector.broadcast %cst_58 : f32 to vector<8x1xf32>
    %168 = arith.addf %167, %166 : vector<8x1xf32>
    %169 = arith.divf %167, %168 : vector<8x1xf32>
    %c0_59 = arith.constant 0 : index
    %c0_60 = arith.constant 0 : index
    %170 = vector.load %arg13[%c0_59, %c0_60] : memref<8x1xf32, #tpu.memory_space<vmem>>, vector<8x1xf32>
    %171 = arith.subf %169, %170 : vector<8x1xf32>
    %172 = arith.mulf %171, %171 : vector<8x1xf32>
    %173 = vector.shape_cast %172 : vector<8x1xf32> to vector<1x8x1xf32>
    %cst_61 = arith.constant dense<0.000000e+00> : vector<1xf32>
    %174 = vector.multi_reduction <add>, %173, %cst_61 [1, 2] : vector<1x8x1xf32> to vector<1xf32>
    %175 = vector.shape_cast %174 : vector<1xf32> to vector<1x1x1xf32>
    %176 = vector.extract %175[0, 0, 0] : f32 from vector<1x1x1xf32>
    %cst_62 = arith.constant 8.000000e+00 : f32
    %177 = arith.divf %176, %cst_62 : f32
    %178 = vector.broadcast %177 : f32 to vector<1x1xf32>
    %c0_63 = arith.constant 0 : index
    %c0_64 = arith.constant 0 : index
    %179 = vector.load %arg16[%c0_63, %c0_64] : memref<1x1xf32, #tpu.memory_space<vmem>>, vector<1x1xf32>
    tpu.vector_store %arg16[%c0_63, %c0_64], %178 {strides = array<i32>} : memref<1x1xf32, #tpu.memory_space<vmem>>, vector<1x1xf32>,
    %c0_65 = arith.constant 0 : index
    %c0_66 = arith.constant 0 : index
    %180 = vector.load %arg17[%c0_65, %c0_66] : memref<1x16xf32, #tpu.memory_space<vmem>>, vector<1x16xf32>
    tpu.vector_store %arg17[%c0_65, %c0_66], %125 {strides = array<i32>} : memref<1x16xf32, #tpu.memory_space<vmem>>, vector<1x16xf32>,
    return
  }
}

</mosaic_0001>

<bundles_post_ra>
// kernel: tpu_custom_call.1
= control target key start
LH: loop header
LB: loop body
LE: loop exit
PB: predicated region body
PF: predicated region fallthrough
CT: control target
= control target key end

     0   :  { %s1706_s0 = inlined_call_operand.vmem [shape: f32[1,16], index: 0, kind: input, shape index: {}]   ;;  %s1707_s1 = inlined_call_operand.vmem [shape: f32[16,16], index: 1, kind: input, shape index: {}]   ;;  %s1708_s2 = inlined_call_operand.vmem [shape: f32[8,16], index: 2, kind: input, shape index: {}]   ;;  %s1709_s3 = inlined_call_operand.vmem [shape: f32[1,16], index: 3, kind: input, shape index: {}]   ;;  %s1710_s4 = inlined_call_operand.vmem [shape: f32[1,16], index: 4, kind: input, shape index: {}]   ;;  %s1711_s5 = inlined_call_operand.vmem [shape: f32[16,1], index: 5, kind: input, shape index: {}]   ;;  %s1712_s6 = inlined_call_operand.<no memory space> [shape: f32[1], index: 6, kind: input, shape index: {}]   ;;  %s1713_s7 = inlined_call_operand.<no memory space> [shape: f32[1], index: 7, kind: input, shape index: {}]   ;;  %s1714_s8 = inlined_call_operand.vmem [shape: f32[8,16], index: 8, kind: input, shape index: {}]   ;;  %s1715_s9 = inlined_call_operand.vmem [shape: f32[32,1], index: 9, kind: input, shape index: {}]   ;;  %s1716_s10 = inlined_call_operand.vmem [shape: f32[32,8], index: 10, kind: input, shape index: {}]   ;;  %s1717_s11 = inlined_call_operand.vmem [shape: f32[8,1], index: 11, kind: input, shape index: {}]   ;;  %s1718_s12 = inlined_call_operand.vmem [shape: f32[8,8], index: 12, kind: input, shape index: {}]   ;;  %s1719_s13 = inlined_call_operand.vmem [shape: f32[8,1], index: 13, kind: input, shape index: {}]   ;;  %s1720_s14 = inlined_call_operand.hbm [shape: f32[1,1], index: 14, kind: output, shape index: {0}]   ;;  %s1721_s15 = inlined_call_operand.hbm [shape: f32[8,16], index: 15, kind: output, shape index: {1}]   ;;  %s1722_s16 = inlined_call_operand.hbm [shape: f32[1,1], index: 16, kind: output, shape index: {2}]   ;;  %s1723_s17 = inlined_call_operand.hbm [shape: f32[1,16], index: 17, kind: output, shape index: {3}]  }
   0x1   :  { %1725 = sst [smem:[#allocation14_spill]] %s1706_s0 }
   0x2   :  { %1726 = sst [smem:[#allocation15_spill]] %s1707_s1 }
   0x3   :  { %25 = vsyncpa [#allocation5], 0 }
   0x4   :  { %26 = vsyncpa [#allocation7], 0  ;;  %s1727_s26 = sld [smem:[#allocation14_spill]]  ;;  %vm209_vm0 = vcmask 122880  }
   0xa   :  { %v1486_v0 = vld [vmem:[%s1727_s26] sm:$0x1] }
   0xb   :  { %27 = vsyncpa [#allocation10], 0  ;;  %v208_v1 = vmul.f32 %v1486_v0, %v1486_v0  ;;  %v1494_v3 = vld [vmem:[%s1708_s2] sm:$0xff]  ;;  %vm99_vm1 = vcmask 64512   ;;  %v66_v5 = vld [vmem:[%s1716_s10 + $0x8] sm:$0xff]  ;;  %s1728_s1 = sld [smem:[#allocation15_spill]]  ;;  %v299_v28 = vlaneseq }
   0xc   :  { %v65_v4 = vld [vmem:[%s1716_s10] sm:$0xff]  ;;  %1161 = vmatprep.subr.mxu0 %v1494_v3  ;;  %v1385_v9 = vmov 0.0|0.0   ;;  %vm1386_vm2 = vmmov 0   ;;  %v1387_v10 = vmov 0.0   ;;  %v1388_v14 = vmov 0   ;;  %v1528_v16 = vld [vmem:[%s1715_s9 + $0x8] sm:$0xff] }
   0xd   :  { %v210_v2 = vsel %vm209_vm0, %v208_v1, 0.0  ;;  %1163 = vmatprep.mubr.msk.f32.mxu0 %vm99_vm1, %v65_v4  ;;  %1162 = vmatpush3.msra.mxu0 %v1494_v3  ;;  %v61_v12 = vld [vmem:[%s1715_s9] sm:$0xff]  ;;  %vm225_vm3 = vcmask 130048   ;;  %v300_v31 = vshrl.u32 %v299_v28, 7  ;;  %v67_v61 = vld [vmem:[%s1716_s10 + $0x10] sm:$0xff]  ;;  %v68_v62 = vld [vmem:[%s1716_s10 + $0x18] sm:$0xff] }
   0xe   :  { %211 = vadd.xlane.f32.xlu0 %v210_v2  ;;  %1164 = vmatmul.mubr.msk.f32.vlgmr.msra.gmra.mrb[0].mxu0 %vm99_vm1, %v66_v5  ;;  %v1542_v27 = vld [vmem:[%s1709_s3] ss:$0 sm:$0xff]  ;;  %v63_v28 = vld [vmem:[%s1715_s9 + $0x10] sm:$0xff]  ;;  %vm795_vm4 = vcmask 0   ;;  %vm1046_vm5 = vcmask 7168  }
   0xf   :  { %1221 = vmatprep.subr.bf16.mxu1 %v1385_v9  ;;  %1227 = vmatprep.subr.bf16.mxu0 %v1385_v9  ;;  %v1548_v33 = vld [vmem:[%s1710_s4] ss:$0 sm:$0xff]  ;;  %v1550_v34 = vsub.s32 0, %v300_v31 }
  0x10   :  { %1173 = vmatprep.mubr.msk.f32.mxu1 %vm1386_vm2, %v1387_v10  ;;  %1267 = vset.pattern.permute.xlu0 %v1388_v14 }
  0x11   :  { %v56_v6 = vld [vmem:[%s1728_s1] sm:$0xff]  ;;  %v57_v7 = vld [vmem:[%s1728_s1 + $0x8] sm:$0xff]  ;;  %1268 = vset.pattern.permute.xlu1 %v1388_v14  ;;  %v309_v40 = vrot.slane %v1486_v0, %v1550_v34  ;;  %1166 = vmatprep.mubr.msk.f32.mxu0 %vm99_vm1, %v67_v61 }
  0x12   :  { %v1512_v8 = vpack.c.bf16 %v57_v7, %v56_v6  ;;  %1167 = vmatmul.mubr.msk.f32.gmra.mrb[2].mxu0 %vm99_vm1, %v68_v62 }
  0x13   :  { %1187 = vmatprep.mubr.msk.f32.mxu0 %vm1386_vm2, %v1387_v10 }
  0x14   :  { %1223 = vmatpush3.bf16.msra.mxu1 %v1512_v8  ;;  %1229 = vmatpush3.bf16.msra.mxu0 %v1512_v8 }
  0x15   :  { %1224 = vmatprep.subr.bf16.mxu1 %v1385_v9  ;;  %1197 = vmatprep.subr.mxu0 %v1387_v10 }
  0x24   :  { %71 = vperm.xlu0 %1267, %v61_v12  }
  0x28   :  { %76 = vperm.xlu0 %1267, %v1528_v16  }
  0x9b   :  { %v212_v11 = vpop.xlane.xlu0 %211 }
  0x9c   :  { %v213_v13 = vrot.slane %v212_v11, 4 }
  0x9e   :  { %v214_v15 = vadd.f32 %v213_v13, %v212_v11 }
  0xa0   :  { %v215_v17 = vrot.slane %v214_v15, 2 }
  0xa2   :  { %v216_v18 = vadd.f32 %v215_v17, %v214_v15 }
  0xa3   :  { %v72_v29 = vpop.permute.xlu0 %71 }
  0xa4   :  { %v217_v19 = vrot.slane %v216_v18, 1  ;;  %v95_v30 = vmul.f32 %v1542_v27, %v72_v29 }
  0xa6   :  { %v218_v20 = vadd.f32 %v217_v19, %v216_v18 }
  0xa7   :  { %v77_v13 = vpop.permute.xlu0 %76 }
  0xa8   :  { %1239 = vpush %v218_v20  ;;  %v96_v14 = vmul.f32 %v1542_v27, %v77_v13 }
  0xd9   :  { %s1240_s26 = spop %1239 }
  0xda   :  { %v220_v21 = vstv %s1240_s26 }
  0xdb   :  { %1269 = vrsqrt.f32 %v220_v21 }
  0xe1   :  { %v1537_v25 = vpop.f32.mrb[0].mxu0 }
  0xe2   :  { %v178_v26 = vpop.f32.mrb[1].mxu0  ;;  %v184_v15 = vadd.f32 %v1537_v25, %v96_v14 }
  0xe3   :  { %v179_v32 = vadd.f32 %v178_v26, %v95_v30 }
  0xe4   :  { %v204_v18 = vadd.f32 %v1548_v33, %v184_v15 }
  0xe5   :  { %v1270_v22 = vpop.eup %1269  ;;  %v203_v35 = vadd.f32 %v1548_v33, %v179_v32  ;;  %v1584_v25 = vpop.f32.mrb[2].mxu0 }
  0xe6   :  { %1241 = vpush %v1270_v22  ;;  %v188_v29 = vpop.f32.mrb[3].mxu0 }
 0x117   :  { %s1242_s27 = spop %1241 }
 0x118   :  { %v223_v23 = vstv %s1242_s27 }
 0x119   :  { %v224_v24 = vmul.f32 %v223_v23, %v1486_v0 }
 0x11b   :  { %1174 = vmatmul.mubr.msk.f32.vlgmr.msra.gmra.mrb[0].mxu1 %vm225_vm3, %v224_v24 }
 0x11c   :  { %1226 = vmatpush3.bf16.msra.mxu1 %v1512_v8  ;;  %1180 = vmatprep.mubr.msk.f32.mxu1 %vm1386_vm2, %v1387_v10 }
 0x11d   :  { %1230 = vmatprep.subr.bf16.mxu1 %v1385_v9 }
 0x1ee   :  { %v295_v36 = vpop.f32.mrb[0].mxu1 }
 0x1ef   :  { %v302_v37 = vrot.slane %v295_v36, %v1550_v34  ;;  %v1175_v38 = vpop.f32.mrb[1].mxu1 }
 0x1f1   :  { %v303_v39 = vadd.f32 %v302_v37, %v203_v35 }
 0x1f3   :  { %1271 = vtanh.f32 %v303_v39 }
 0x1fd   :  { %v1272_v41 = vpop.eup %1271 }
 0x1fe   :  { %v311_v42 = vmul.f32 %v1272_v41, %v309_v40 }
 0x200   :  { %v312_v43 = vsel %vm225_vm3, %v311_v42, 0.0 }
 0x201   :  { %313 = vadd.xlane.f32.xlu1 %v312_v43 }
 0x28e   :  { %v314_v44 = vpop.xlane.xlu1 %313 }
 0x28f   :  { %v315_v45 = vsub.f32 %v314_v44, %v61_v12 }
 0x291   :  { %318 = vperm.xlu1 %1268, %v315_v45  }
 0x310   :  { %v319_v46 = vpop.permute.xlu1 %318 }
 0x311   :  { %v321_v47 = vmul.f32 %v1272_v41, %v319_v46 }
 0x313   :  { %v322_v48 = vsel %vm225_vm3, %v321_v47, 0.0 }
 0x314   :  { %v323_v49 = vrot.slane %v322_v48, 4 }
 0x316   :  { %v324_v50 = vadd.f32 %v323_v49, %v322_v48 }
 0x318   :  { %v325_v51 = vrot.slane %v324_v50, 2 }
 0x31a   :  { %v326_v52 = vadd.f32 %v325_v51, %v324_v50 }
 0x31c   :  { %v327_v53 = vrot.slane %v326_v52, 1 }
 0x31e   :  { %v328_v54 = vadd.f32 %v327_v53, %v326_v52 }
 0x320   :  { %v329_v55 = vmul.f32 0.25, %v328_v54 }
 0x322   :  { %v330_v56 = vmul.f32 0.001, %v329_v55 }
 0x324   :  { %v331_v57 = vsub.f32 %v1486_v0, %v330_v56 }
 0x326   :  { %v332_v58 = vmul.f32 %v331_v57, %v331_v57  ;;  %v431_v22 = vrot.slane %v331_v57, %v1550_v34 }
 0x328   :  { %v333_v59 = vsel %vm209_vm0, %v332_v58, 0.0 }
 0x329   :  { %334 = vadd.xlane.f32.xlu1 %v333_v59 }
 0x3b6   :  { %v335_v60 = vpop.xlane.xlu1 %334 }
 0x3b7   :  { %v336_v63 = vrot.slane %v335_v60, 4 }
 0x3b9   :  { %v337_v1 = vadd.f32 %v336_v63, %v335_v60 }
 0x3bb   :  { %v338_v0 = vrot.slane %v337_v1, 2 }
 0x3bd   :  { %v339_v2 = vadd.f32 %v338_v0, %v337_v1 }
 0x3bf   :  { %v340_v4 = vrot.slane %v339_v2, 1 }
 0x3c1   :  { %v341_v5 = vadd.f32 %v340_v4, %v339_v2 }
 0x3c3   :  { %1243 = vpush %v341_v5 }
 0x3f4   :  { %s1244_s2 = spop %1243 }
 0x3f5   :  { %v343_v6 = vstv %s1244_s2 }
 0x3f6   :  { %1273 = vrsqrt.f32 %v343_v6 }
 0x400   :  { %v1274_v7 = vpop.eup %1273 }
 0x401   :  { %1245 = vpush %v1274_v7  ;;  %v64_v7 = vld [vmem:[%s1715_s9 + $0x18] sm:$0xff] }
 0x432   :  { %s1246_s10 = spop %1245 }
 0x433   :  { %v346_v11 = vstv %s1246_s10 }
 0x434   :  { %v347_v12 = vmul.f32 %v346_v11, %v331_v57 }
 0x436   :  { %1181 = vmatmul.mubr.msk.f32.vlgmr.msra.gmra.mrb[2].mxu1 %vm225_vm3, %v347_v12 }
 0x437   :  { %1232 = vmatpush3.bf16.msra.mxu1 %v1512_v8  ;;  %1194 = vmatprep.mubr.msk.f32.mxu1 %vm1386_vm2, %v1387_v10 }
 0x438   :  { %1202 = vmatprep.subr.mxu1 %v1387_v10 }
 0x509   :  { %v417_v17 = vpop.f32.mrb[2].mxu1 }
 0x50a   :  { %v424_v19 = vrot.slane %v417_v17, %v1550_v34  ;;  %v1182_v20 = vpop.f32.mrb[3].mxu1 }
 0x50c   :  { %v425_v21 = vadd.f32 %v424_v19, %v204_v18 }
 0x50e   :  { %1275 = vtanh.f32 %v425_v21 }
 0x518   :  { %v1276_v23 = vpop.eup %1275 }
 0x519   :  { %v433_v24 = vmul.f32 %v1276_v23, %v431_v22 }
 0x51b   :  { %v434_v26 = vsel %vm225_vm3, %v433_v24, 0.0 }
 0x51c   :  { %435 = vadd.xlane.f32.xlu0 %v434_v26 }
 0x532   :  { %81 = vperm.xlu0 %1267, %v63_v28  }
 0x5a9   :  { %v436_v30 = vpop.xlane.xlu0 %435 }
 0x5aa   :  { %v437_v31 = vsub.f32 %v436_v30, %v1528_v16 }
 0x5ac   :  { %440 = vperm.xlu1 %1268, %v437_v31  }
 0x5b1   :  { %v82_v58 = vpop.permute.xlu0 %81 }
 0x5b2   :  { %v97_v59 = vmul.f32 %v1542_v27, %v82_v58  ;;  %v698_v58 = vld [vmem:[%s1714_s8] sm:$0xff] }
 0x5b4   :  { %v189_v60 = vadd.f32 %v188_v29, %v97_v59 }
 0x5b6   :  { %v205_v62 = vadd.f32 %v1548_v33, %v189_v60 }
 0x62b   :  { %v441_v32 = vpop.permute.xlu1 %440 }
 0x62c   :  { %v443_v35 = vmul.f32 %v1276_v23, %v441_v32 }
 0x62e   :  { %v444_v36 = vsel %vm225_vm3, %v443_v35, 0.0 }
 0x62f   :  { %v445_v37 = vrot.slane %v444_v36, 4 }
 0x631   :  { %v446_v38 = vadd.f32 %v445_v37, %v444_v36 }
 0x633   :  { %v447_v39 = vrot.slane %v446_v38, 2 }
 0x635   :  { %v448_v40 = vadd.f32 %v447_v39, %v446_v38 }
 0x637   :  { %v449_v41 = vrot.slane %v448_v40, 1 }
 0x639   :  { %v450_v42 = vadd.f32 %v449_v41, %v448_v40 }
 0x63b   :  { %v451_v43 = vmul.f32 0.25, %v450_v42 }
 0x63d   :  { %v452_v44 = vmul.f32 0.001, %v451_v43  ;;  %v798_v43 = vld [vmem:[%s1718_s12] sm:$0xff] }
 0x63f   :  { %v453_v45 = vsub.f32 %v331_v57, %v452_v44 }
 0x641   :  { %v454_v46 = vmul.f32 %v453_v45, %v453_v45  ;;  %v553_v2 = vrot.slane %v453_v45, %v1550_v34 }
 0x643   :  { %v455_v47 = vsel %vm209_vm0, %v454_v46, 0.0 }
 0x644   :  { %456 = vadd.xlane.f32.xlu1 %v455_v47 }
 0x6d1   :  { %v457_v48 = vpop.xlane.xlu1 %456 }
 0x6d2   :  { %v458_v16 = vrot.slane %v457_v48, 4 }
 0x6d4   :  { %v459_v49 = vadd.f32 %v458_v16, %v457_v48 }
 0x6d6   :  { %v460_v50 = vrot.slane %v459_v49, 2 }
 0x6d8   :  { %v461_v51 = vadd.f32 %v460_v50, %v459_v49 }
 0x6da   :  { %v462_v52 = vrot.slane %v461_v51, 1 }
 0x6dc   :  { %v463_v53 = vadd.f32 %v462_v52, %v461_v51 }
 0x6de   :  { %1247 = vpush %v463_v53 }
 0x70f   :  { %s1248_s21 = spop %1247 }
 0x710   :  { %v465_v54 = vstv %s1248_s21  ;;  %s1390_s21 = smov [#allocation4]  }
 0x711   :  { %1277 = vrsqrt.f32 %v465_v54 }
 0x71b   :  { %v1278_v55 = vpop.eup %1277 }
 0x71c   :  { %1249 = vpush %v1278_v55 }
 0x74d   :  { %s1250_s22 = spop %1249 }
 0x74e   :  { %v468_v56 = vstv %s1250_s22  ;;  %s1069_s22 = sshll.u32 %s1390_s21, 4  ;;  %s1070_s22 = int_to_ptr.vmem [resolvable:$true] %s1069_s22 }
 0x74f   :  { %v469_v57 = vmul.f32 %v468_v56, %v453_v45 }
 0x751   :  { %1188 = vmatmul.mubr.msk.f32.vlgmr.msra.gmra.mrb[4].mxu0 %vm225_vm3, %v469_v57 }
 0x752   :  { %1199 = vmatprep.mubr.msk.f32.mxu0 %vm1386_vm2, %v1387_v10  ;;  %1198 = vmatpush3.xpose.msk.msra.mxu0 %vm225_vm3, %v698_v58 }
 0x753   :  { %1233 = vmatprep.subr.bf16.mxu0 %v1385_v9 }
 0x824   :  { %v539_v61 = vpop.f32.mrb[4].mxu0 }
 0x825   :  { %v546_v63 = vrot.slane %v539_v61, %v1550_v34  ;;  %v1189_v1 = vpop.f32.mrb[5].mxu0 }
 0x827   :  { %v547_v0 = vadd.f32 %v546_v63, %v205_v62 }
 0x829   :  { %1279 = vtanh.f32 %v547_v0 }
 0x833   :  { %v1280_v4 = vpop.eup %1279 }
 0x834   :  { %v555_v5 = vmul.f32 %v1280_v4, %v553_v2 }
 0x836   :  { %v556_v6 = vsel %vm225_vm3, %v555_v5, 0.0 }
 0x837   :  { %557 = vadd.xlane.f32.xlu0 %v556_v6 }
 0x84d   :  { %86 = vperm.xlu0 %1267, %v64_v7  }
 0x8c4   :  { %v558_v11 = vpop.xlane.xlu0 %557 }
 0x8c5   :  { %v559_v12 = vsub.f32 %v558_v11, %v63_v28  ;;  %v957_v11 = vld [vmem:[%s1711_s5 + $0x8] sm:$0xff] }
 0x8c7   :  { %562 = vperm.xlu1 %1268, %v559_v12  }
 0x8cc   :  { %v87_v44 = vpop.permute.xlu0 %86 }
 0x946   :  { %v563_v13 = vpop.permute.xlu1 %562 }
 0x947   :  { %v565_v14 = vmul.f32 %v1280_v4, %v563_v13 }
 0x949   :  { %v566_v15 = vsel %vm225_vm3, %v565_v14, 0.0 }
 0x94a   :  { %v567_v17 = vrot.slane %v566_v15, 4 }
 0x94c   :  { %v568_v18 = vadd.f32 %v567_v17, %v566_v15 }
 0x94e   :  { %v569_v19 = vrot.slane %v568_v18, 2 }
 0x950   :  { %v570_v20 = vadd.f32 %v569_v19, %v568_v18 }
 0x952   :  { %v571_v21 = vrot.slane %v570_v20, 1 }
 0x954   :  { %v572_v22 = vadd.f32 %v571_v21, %v570_v20 }
 0x956   :  { %v573_v23 = vmul.f32 0.25, %v572_v22 }
 0x958   :  { %v574_v24 = vmul.f32 0.001, %v573_v23 }
 0x95a   :  { %v575_v26 = vsub.f32 %v453_v45, %v574_v24  ;;  %v98_v45 = vmul.f32 %v1542_v27, %v87_v44 }
 0x95c   :  { %v576_v29 = vmul.f32 %v575_v26, %v575_v26  ;;  %v194_v46 = vadd.f32 %v1584_v25, %v98_v45  ;;  %v675_v50 = vrot.slane %v575_v26, %v1550_v34  ;;  %v797_v25 = vld [vmem:[%s1717_s11] sm:$0xff] }
 0x95e   :  { %v577_v30 = vsel %vm209_vm0, %v576_v29, 0.0  ;;  %v206_v47 = vadd.f32 %v1548_v33, %v194_v46  ;;  %v1043_v46 = vld [vmem:[%s1719_s13] sm:$0xff] }
 0x95f   :  { %578 = vadd.xlane.f32.xlu1 %v577_v30 }
 0x9ec   :  { %v579_v31 = vpop.xlane.xlu1 %578 }
 0x9ed   :  { %v580_v28 = vrot.slane %v579_v31, 4 }
 0x9ef   :  { %v581_v32 = vadd.f32 %v580_v28, %v579_v31 }
 0x9f1   :  { %v582_v35 = vrot.slane %v581_v32, 2 }
 0x9f3   :  { %v583_v36 = vadd.f32 %v582_v35, %v581_v32 }
 0x9f5   :  { %v584_v37 = vrot.slane %v583_v36, 1 }
 0x9f7   :  { %v585_v38 = vadd.f32 %v584_v37, %v583_v36 }
 0x9f9   :  { %1251 = vpush %v585_v38 }
 0xa2a   :  { %s1252_s9 = spop %1251 }
 0xa2b   :  { %v587_v39 = vstv %s1252_s9 }
 0xa2c   :  { %1281 = vrsqrt.f32 %v587_v39  ;;  %v1035_v39 = vstv %s1713_s7 }
 0xa36   :  { %v1282_v40 = vpop.eup %1281 }
 0xa37   :  { %1253 = vpush %v1282_v40 }
 0xa68   :  { %s1254_s25 = spop %1253 }
 0xa69   :  { %v590_v41 = vstv %s1254_s25 }
 0xa6a   :  { %v591_v42 = vmul.f32 %v590_v41, %v575_v26 }
 0xa6c   :  { %1195 = vmatmul.mubr.msk.f32.vlgmr.msra.gmra.mrb[4].mxu1 %vm225_vm3, %v591_v42 }
 0xa6d   :  { %1203 = vmatpush3.msra.mxu1 %v1494_v3  ;;  %1204 = vmatprep.mubr.msk.f32.mxu1 %vm1386_vm2, %v1387_v10 }
 0xa6e   :  { %1236 = vmatprep.subr.bf16.mxu1 %v1385_v9  ;;  %v956_v9 = vld [vmem:[%s1711_s5] sm:$0xff] }
 0xa6f   :  { %v1237_v12 = vpack.c.bf16 %v957_v11, %v956_v9 }
 0xa70   :  { %1205 = vmatmul.mubr.msk.f32.vlgmr.msra.gmra.mrb[6].mxu1 %vm99_vm1, %v798_v43 }
 0xa71   :  { %1218 = vmatprep.mubr.msk.f32.mxu1 %vm1386_vm2, %v1387_v10  ;;  %1238 = vmatpush3.bf16.msra.mxu1 %v1237_v12 }
 0xb3f   :  { %v661_v3 = vpop.f32.mrb[4].mxu1 }
 0xb40   :  { %v668_v48 = vrot.slane %v661_v3, %v1550_v34  ;;  %v1196_v16 = vpop.f32.mrb[5].mxu1 }
 0xb42   :  { %v669_v49 = vadd.f32 %v668_v48, %v206_v47 }
 0xb43   :  { %v874_v56 = vpop.f32.mrb[6].mxu1 }
 0xb44   :  { %1283 = vtanh.f32 %v669_v49  ;;  %v1206_v57 = vpop.f32.mrb[7].mxu1 }
 0xb4e   :  { %v1284_v51 = vpop.eup %1283 }
 0xb4f   :  { %v677_v52 = vmul.f32 %v1284_v51, %v675_v50 }
 0xb51   :  { %v678_v53 = vsel %vm225_vm3, %v677_v52, 0.0 }
 0xb52   :  { %679 = vadd.xlane.f32.xlu0 %v678_v53 }
 0xbdf   :  { %v680_v54 = vpop.xlane.xlu0 %679 }
 0xbe0   :  { %v681_v55 = vsub.f32 %v680_v54, %v64_v7 }
 0xbe2   :  { %684 = vperm.xlu1 %1268, %v681_v55  }
 0xbe6   :  { %801 = vperm.xlu1 %1268, %v797_v25  }
 0xc61   :  { %v685_v59 = vpop.permute.xlu1 %684 }
 0xc62   :  { %v687_v60 = vmul.f32 %v1284_v51, %v685_v59 }
 0xc64   :  { %v688_v61 = vsel %vm225_vm3, %v687_v60, 0.0 }
 0xc65   :  { %v689_v62 = vrot.slane %v688_v61, 4  ;;  %v802_v13 = vpop.permute.xlu1 %801 }
 0xc66   :  { %v804_v15 = vmul.f32 %v1542_v27, %v802_v13 }
 0xc67   :  { %v690_v63 = vadd.f32 %v689_v62, %v688_v61 }
 0xc68   :  { %v875_v19 = vadd.f32 %v874_v56, %v804_v15 }
 0xc69   :  { %v691_v1 = vrot.slane %v690_v63, 2 }
 0xc6b   :  { %v692_v0 = vadd.f32 %v691_v1, %v690_v63 }
 0xc6d   :  { %v693_v2 = vrot.slane %v692_v0, 1 }
 0xc6f   :  { %v694_v4 = vadd.f32 %v693_v2, %v692_v0 }
 0xc71   :  { %v695_v5 = vmul.f32 0.25, %v694_v4 }
 0xc73   :  { %v696_v6 = vmul.f32 0.001, %v695_v5 }
 0xc75   :  { %v697_v7 = vsub.f32 %v575_v26, %v696_v6 }
 0xc77   :  { %1062 = vst.msk [vmem:[#allocation9] sm:$0x1] %vm209_vm0, %v697_v7  ;;  %1200 = vmatmul.mubr.msk.f32.vlgmr.msra.gmra.mrb[6].mxu0 %vm225_vm3, %v697_v7 }
 0xc78   :  { %1235 = vmatpush3.bf16.msra.mxu0 %v1512_v8  ;;  %1211 = vmatprep.mubr.msk.f32.mxu0 %vm1386_vm2, %v1387_v10 }
 0xc7b   :  { %1212 = vmatmul.mubr.msk.f32.vlgmr.msra.gmra.mrb[8].mxu0 %vm225_vm3, %v697_v7 }
 0xd4a   :  { %v771_v14 = vpop.f32.mrb[6].mxu0 }
 0xd4b   :  { %v778_v8 = vrot.slane %v771_v14, %v1550_v34  ;;  %v1201_v17 = vpop.f32.mrb[7].mxu0 }
 0xd4d   :  { %v779_v10 = vsub.f32 %v778_v8, %v87_v44 }
 0xd4e   :  { %v944_v18 = vpop.f32.mrb[8].mxu0 }
 0xd4f   :  { %v951_v20 = vrot.slane %v944_v18, %v1550_v34  ;;  %v1213_v21 = vpop.f32.mrb[9].mxu0  ;;  %v780_v22 = vmul.f32 %v779_v10, %v779_v10 }
 0xd51   :  { %v952_v23 = vadd.f32 %v951_v20, %v875_v19  ;;  %v781_v24 = vsel %vm99_vm1, %v780_v22, 0.0 }
 0xd52   :  { %782 = vadd.xlane.f32.xlu1 %v781_v24 }
 0xd53   :  { %v953_v26 = vadd.f32 %v1548_v33, %v952_v23  ;;  %v959_v33 = vstv %s1712_s6  ;;  %s1389_s6 = smov [#allocation6]  }
 0xd54   :  { %v960_v37 = vmul.f32 %v959_v33, %v797_v25  ;;  %s1079_s7 = sshll.u32 %s1389_s6, 4  ;;  %s1080_s7 = int_to_ptr.vmem [resolvable:$true] %s1079_s7 }
 0xd55   :  { %1285 = vtanh.f32 %v953_v26  ;;  %s1291_s23 = scalar_lea.vmem %s1080_s7, 128  ;;  %p1296_p1 = scmp.lt.s32.totalorder %s1080_s7, %s1080_s7 }
 0xd56   :  { %p1292_p0 = scmp.ne.s32.totalorder %s1080_s7, %s1291_s23  ;;  %p1297_p2 = scmp.lt.s32.totalorder %s1291_s23, %s1291_s23 }
 0xd58   :  { %p1298_p3 = por %p1297_p2, %p1296_p1 }
 0xd5a   :  { %p1299_p4 = pnand %p1298_p3, %p1292_p0 }
 0xd5f   :  { %v1286_v29 = vpop.eup %1285 }
 0xd60   :  { %955 = vst.msk [vmem:[#allocation6] sm:$0xff] %vm225_vm3, %v1286_v29  ;;  %1219 = vmatmul.mubr.msk.f32.vlgmr.msra.gmra.mrb[8].mxu1 %vm225_vm3, %v1286_v29 }
 0xddf   :  { %v783_v27 = vpop.xlane.xlu1 %782 }
 0xde0   :  { %v784_v30 = vrot.slane %v783_v27, 4 }
 0xde2   :  { %v785_v31 = vadd.f32 %v784_v30, %v783_v27 }
 0xde4   :  { %v786_v28 = vrot.slane %v785_v31, 2 }
 0xde6   :  { %v787_v32 = vadd.f32 %v786_v28, %v785_v31 }
 0xde8   :  { %v788_v34 = vrot.slane %v787_v32, 1 }
 0xdea   :  { %v789_v35 = vadd.f32 %v788_v34, %v787_v32 }
 0xdec   :  { %1255 = vpush %v789_v35 }
 0xe1d   :  { %s1256_s5 = spop %1255 }
 0xe1e   :  { %s793_s4 = smul.f32 0.015625, %s1256_s5 }
 0xe20   :  { %v794_v36 = vstv %s793_s4 }
 0xe21   :  { %796 = vst.msk [vmem:[#allocation4] sm:$0x1] %vm795_vm4, %v794_v36 }
 0xe33   :  { %v1030_v38 = vpop.f32.mrb[8].mxu1 }
 0xe34   :  { %v1031_v40 = vadd.f32 %v1030_v38, %v960_v37  ;;  %v1220_v41 = vpop.f32.mrb[9].mxu1 }
 0xe36   :  { %v1036_v42 = vadd.f32 %v1035_v39, %v1031_v40 }
 0xe38   :  { %v1133_v43 = vmul.f32 -1.442695, %v1036_v42 }
 0xe3a   :  { %1287 = vpow2.f32 %v1133_v43 }
 0xe44   :  { %v1288_v44 = vpop.eup %1287 }
 0xe45   :  { %v1040_v45 = vadd.f32 1.0, %v1288_v44 }
 0xe47   :  { %1289 = vrcp.f32 %v1040_v45 }
 0xe51   :  { %v1290_v3 = vpop.eup %1289 }
 0xe52   :  { %v1044_v47 = vsub.f32 %v1290_v3, %v1043_v46 }
 0xe54   :  { %v1045_v48 = vmul.f32 %v1044_v47, %v1044_v47 }
 0xe56   :  { %v1047_v16 = vsel %vm1046_vm5, %v1045_v48, 0.0 }
 0xe57   :  { %1048 = vadd.xlane.f32.xlu0 %v1047_v16 }
 0xe58   :  { %1302 = shalt.err (!%p1299_p4)
}
 0xe59   :  { %s1303_s9 = scalar_lea.hbm %s1721_s15, 128 }
 0xe5a   :  { %p1304_p5 = scmp.ne.s32.totalorder %s1721_s15, %s1303_s9  ;;  %p1307_p6 = scmp.lt.u32.totalorder %s1303_s9, %s1721_s15 }
 0xe5c   :  { %p1309_p7 = pnand %p1307_p6, %p1304_p5 }
 0xe5e   :  { %1312 = shalt.err (!%p1309_p7)
}
 0xe5f   :  { %1082 = dma.vmem_to_hbm [thread:$0]  %s1080_s7, 128, %s1721_s15, [#allocation7]  }
 0xe60   :  { %s1313_s0 = scalar_lea.vmem %s1070_s22, 16  ;;  %s1317_s8 = scalar_lea.vmem %s1070_s22, 32 }
 0xe61   :  { %p1314_p8 = scmp.ne.s32.totalorder %s1070_s22, %s1313_s0  ;;  %p1318_p9 = scmp.lt.s32.totalorder %s1070_s22, %s1070_s22 }
 0xe62   :  { %p1319_p10 = scmp.lt.s32.totalorder %s1317_s8, %s1313_s0 }
 0xe64   :  { %p1320_p11 = por %p1319_p10, %p1318_p9 }
 0xe66   :  { %p1321_p12 = pnand %p1320_p11, %p1314_p8 }
 0xe68   :  { %1324 = shalt.err (!%p1321_p12)
}
 0xe69   :  { %s1325_s3 = scalar_lea.hbm %s1720_s14, 16 }
 0xe6a   :  { %p1326_p13 = scmp.ne.s32.totalorder %s1720_s14, %s1325_s3  ;;  %p1329_p0 = scmp.lt.u32.totalorder %s1325_s3, %s1720_s14 }
 0xe6c   :  { %p1331_p1 = pnand %p1329_p0, %p1326_p13 }
 0xe6e   :  { %1334 = shalt.err (!%p1331_p1)
}
 0xe6f   :  { %1072 = dma.vmem_to_hbm [thread:$0]  %s1070_s22, 16, %s1720_s14, [#allocation5]  }
 0xe70   :  { %s1391_s10 = smov [#allocation9]  }
 0xe71   :  { %s1099_s1 = sshll.u32 %s1391_s10, 4  ;;  %s1100_s1 = int_to_ptr.vmem [resolvable:$true] %s1099_s1 }
 0xe72   :  { %s1335_s20 = scalar_lea.vmem %s1100_s1, 16  ;;  %s1339_s6 = scalar_lea.vmem %s1100_s1, 32 }
 0xe73   :  { %p1336_p2 = scmp.ne.s32.totalorder %s1100_s1, %s1335_s20  ;;  %p1340_p3 = scmp.lt.s32.totalorder %s1100_s1, %s1100_s1 }
 0xe74   :  { %p1341_p4 = scmp.lt.s32.totalorder %s1339_s6, %s1335_s20 }
 0xe76   :  { %p1342_p5 = por %p1341_p4, %p1340_p3 }
 0xe78   :  { %p1343_p6 = pnand %p1342_p5, %p1336_p2 }
 0xe7a   :  { %1346 = shalt.err (!%p1343_p6)
}
 0xe7b   :  { %s1347_s23 = scalar_lea.hbm %s1723_s17, 16 }
 0xe7c   :  { %p1348_p7 = scmp.ne.s32.totalorder %s1723_s17, %s1347_s23  ;;  %p1351_p8 = scmp.lt.u32.totalorder %s1347_s23, %s1723_s17 }
 0xe7e   :  { %p1353_p9 = pnand %p1351_p8, %p1348_p7 }
 0xe80   :  { %1356 = shalt.err (!%p1353_p9)
}
 0xe81   :  { %1102 = dma.vmem_to_hbm [thread:$0]  %s1100_s1, 16, %s1723_s17, [#allocation10]  }
 0xe82   :  { %s1392_s26 = smov [#allocation8]  }
 0xe83   :  { %s1089_s27 = sshll.u32 %s1392_s26, 4  ;;  %s1090_s27 = int_to_ptr.vmem [resolvable:$true] %s1089_s27 }
 0xe84   :  { %s1357_s29 = scalar_lea.vmem %s1090_s27, 16  ;;  %s1361_s0 = scalar_lea.vmem %s1090_s27, 32 }
 0xe85   :  { %p1358_p10 = scmp.ne.s32.totalorder %s1090_s27, %s1357_s29  ;;  %p1362_p11 = scmp.lt.s32.totalorder %s1090_s27, %s1090_s27 }
 0xe86   :  { %p1363_p12 = scmp.lt.s32.totalorder %s1361_s0, %s1357_s29 }
 0xe88   :  { %p1364_p13 = por %p1363_p12, %p1362_p11 }
 0xe8a   :  { %p1365_p0 = pnand %p1364_p13, %p1358_p10 }
 0xee4   :  { %v1049_v49 = vpop.xlane.xlu0 %1048 }
 0xee5   :  { %v1050_v50 = vrot.slane %v1049_v49, 4 }
 0xee7   :  { %v1051_v51 = vadd.f32 %v1050_v50, %v1049_v49 }
 0xee9   :  { %v1052_v52 = vrot.slane %v1051_v51, 2 }
 0xeeb   :  { %v1053_v53 = vadd.f32 %v1052_v52, %v1051_v51 }
 0xeed   :  { %v1054_v54 = vrot.slane %v1053_v53, 1 }
 0xeef   :  { %v1055_v55 = vadd.f32 %v1054_v54, %v1053_v53 }
 0xef1   :  { %1257 = vpush %v1055_v55 }
 0xf22   :  { %s1258_s12 = spop %1257 }
 0xf23   :  { %s1059_s28 = smul.f32 0.125, %s1258_s12 }
 0xf25   :  { %v1060_v25 = vstv %s1059_s28 }
 0xf26   :  { %1061 = vst.msk [vmem:[#allocation8] sm:$0x1] %vm795_vm4, %v1060_v25 }
 0xf27   :  { %1368 = shalt.err (!%p1365_p0)
}
 0xf28   :  { %s1369_s11 = scalar_lea.hbm %s1722_s16, 16 }
 0xf29   :  { %p1370_p1 = scmp.ne.s32.totalorder %s1722_s16, %s1369_s11  ;;  %p1373_p2 = scmp.lt.u32.totalorder %s1369_s11, %s1722_s16 }
 0xf2b   :  { %p1375_p3 = pnand %p1373_p2, %p1370_p1 }
 0xf2d   :  { %1378 = shalt.err (!%p1375_p3)
}
 0xf2e   :  { %1092 = dma.vmem_to_hbm [thread:$0]  %s1090_s27, 16, %s1722_s16, [#allocation7]  }
 0xf2f   :  { %1379 = dma.done.wait [#allocation5], 16  }
 0xf30   :  { %1380 = vsyncadd [#allocation5], 4294967280 }
 0xf31   :  { %1381 = dma.done.wait [#allocation7], 144  }
 0xf32   :  { %1382 = vsyncadd [#allocation7], 4294967152 }
 0xf33   :  { %1383 = dma.done.wait [#allocation10], 16  }
 0xf34   :  { %1384 = vsyncadd [#allocation10], 4294967280 }
 0xf35   :  { %1115 = vsyncpa [#allocation5], 1 }
 0xf36   :  { %1116 = vsyncpa [#allocation7], 1 }
 0xf37   :  { %1117 = vsyncpa [#allocation10], 1 }

</bundles_post_ra>
